<compile_context>
chip_gen: v7x
topology: tpu7x:2x2x1
jax: 0.10.0
libtpu: 0.0.40
codegen_flags: <defaults>
</compile_context>

<pallas_src>
import jax
import jax.numpy as jnp
from jax.experimental import pallas as pl
from jax.experimental.pallas import tpu as pltpu

LANE = 128      # TPU lane width (last-dim alignment)
SUBLANE = 8     # f32 sublane width (second-to-last dim alignment)
H1 = 256        # hidden size of linear1 (already a multiple of 128)
H2 = 64         # hidden size of linear2 (padded to 128 for the kernel)


def _round_up(n, m):
    return (n + m - 1) // m * m


def mlp_kernel(x_ref, w1_ref, b1_ref, w2_ref, b2_ref, w3_ref, b3_ref, o_ref):
    # x tile: (TB, Kp). Weights are full (padded) matrices, resident in VMEM.
    x = x_ref[...]
    # linear1 + ReLU
    h1 = jnp.dot(x, w1_ref[...], preferred_element_type=jnp.float32) + b1_ref[...]
    h1 = jnp.maximum(h1, 0.0)
    # linear2 + ReLU
    h2 = jnp.dot(h1, w2_ref[...], preferred_element_type=jnp.float32) + b2_ref[...]
    h2 = jnp.maximum(h2, 0.0)
    # linear3 (no activation, matching the PyTorch Sequential)
    out = jnp.dot(h2, w3_ref[...], preferred_element_type=jnp.float32) + b3_ref[...]
    o_ref[...] = out.astype(o_ref.dtype)


def init_params(key, input_dim, num_classes):
    """Deterministic synthetic init (PyTorch-Linear-style fan_in scaling).

    Weights are stored transposed vs. torch, i.e. (in_features, out_features),
    so the kernel computes y = x @ W + b. These are the *unpadded* params used
    by the pure-JAX reference.
    """
    ks = jax.random.split(key, 6)

    def linear(kw, kb, fan_in, fan_out):
        bound = 1.0 / (fan_in ** 0.5)
        w = jax.random.uniform(kw, (fan_in, fan_out), jnp.float32, -bound, bound)
        b = jax.random.uniform(kb, (fan_out,), jnp.float32, -bound, bound)
        return w, b

    w1, b1 = linear(ks[0], ks[1], input_dim, H1)
    w2, b2 = linear(ks[2], ks[3], H1, H2)
    w3, b3 = linear(ks[4], ks[5], H2, num_classes)
    return {"w1": w1, "b1": b1, "w2": w2, "b2": b2, "w3": w3, "b3": b3}


def pad_params(raw):
    """Zero-pad weights/biases so every matmul dim is a multiple of 128.

    Zero-padded K rows contribute nothing to the dot; zero-padded output
    columns are sliced off in the wrapper, so results are bit-identical.
    """
    def pad_w(w, rows, cols):
        return jnp.zeros((rows, cols), w.dtype).at[:w.shape[0], :w.shape[1]].set(w)

    def pad_b(b, cols):
        return jnp.zeros((1, cols), b.dtype).at[0, :b.shape[0]].set(b)

    in_dim = raw["w1"].shape[0]
    ncls = raw["w3"].shape[1]
    kp = _round_up(in_dim, LANE)
    h2p = _round_up(H2, LANE)
    np_ = _round_up(ncls, LANE)

    return {
        "w1": pad_w(raw["w1"], kp, H1),  "b1": pad_b(raw["b1"], H1),
        "w2": pad_w(raw["w2"], H1, h2p), "b2": pad_b(raw["b2"], h2p),
        "w3": pad_w(raw["w3"], h2p, np_), "b3": pad_b(raw["b3"], np_),
    }


def mlp_forward(x, padded_params, num_classes, *, tb_max=512):
    """x: (B, input_dim) float32. padded_params: output of pad_params()."""
    w1, b1 = padded_params["w1"], padded_params["b1"]
    w2, b2 = padded_params["w2"], padded_params["b2"]
    w3, b3 = padded_params["w3"], padded_params["b3"]

    B, in_dim = x.shape
    Kp = w1.shape[0]     # padded input dim (multiple of 128)
    H1p = w1.shape[1]    # 256
    H2p = w2.shape[1]    # padded hidden 2 (128)
    Np = w3.shape[1]     # padded num_classes (multiple of 128)

    # Batch tile: multiple of 8 (f32 sublane), capped at tb_max so the working
    # set (2x double-buffered x/out tiles + resident weights + intermediates)
    # stays far under the 32 MiB scoped-VMEM default even on v7x (64 MiB phys).
    TB = min(tb_max, _round_up(B, SUBLANE))
    Bp = _round_up(B, TB)

    # Pad activations: columns to Kp (zeros are a no-op in the dot), rows to a
    # TB multiple (extra rows sliced off below).
    xp = jnp.zeros((Bp, Kp), x.dtype).at[:B, :in_dim].set(x)

    resident = lambda shape: pl.BlockSpec(shape, lambda i: (0, 0))

    flops = 2 * Bp * (Kp * H1p + H1p * H2p + H2p * Np)
    bytes_accessed = 4 * (
        Bp * Kp + Bp * Np                     # activations in / out
        + Kp * H1p + H1p * H2p + H2p * Np     # weights
        + H1p + H2p + Np                      # biases
    )

    out_padded = pl.pallas_call(
        mlp_kernel,
        out_shape=jax.ShapeDtypeStruct((Bp, Np), x.dtype),
        grid=(Bp // TB,),
        in_specs=[
            pl.BlockSpec((TB, Kp), lambda i: (i, 0)),   # x: tiled over batch
            resident(w1.shape), resident(b1.shape),      # weights stay resident
            resident(w2.shape), resident(b2.shape),
            resident(w3.shape), resident(b3.shape),
        ],
        out_specs=pl.BlockSpec((TB, Np), lambda i: (i, 0)),
        compiler_params=pltpu.CompilerParams(
            dimension_semantics=("parallel",),           # megacore shard on v7x
        ),
        cost_estimate=pl.CostEstimate(
            flops=flops, bytes_accessed=bytes_accessed, transcendentals=0),
    )(xp, w1, b1, w2, b2, w3, b3)

    return out_padded[:B, :num_classes]


def mlp_reference(x, p):
    h1 = jnp.maximum(x @ p["w1"] + p["b1"], 0.0)
    h2 = jnp.maximum(h1 @ p["w2"] + p["b2"], 0.0)
    return h2 @ p["w3"] + p["b3"]


if __name__ == "__main__":
    key = jax.random.PRNGKey(0)
    k_x1, k_x2, k_p = jax.random.split(key, 3)

    input_dim, num_classes = 32, 10
    raw_params = init_params(k_p, input_dim, num_classes)
    padded_params = pad_params(raw_params)

    # Small primary test (batch multiple of 8).
    x1 = jax.random.normal(k_x1, (8, input_dim), jnp.float32)
    out1 = jax.block_until_ready(mlp_forward(x1, padded_params, num_classes))
    ref1 = mlp_reference(x1, raw_params)
    assert out1.shape == (8, num_classes)
    assert jnp.allclose(out1, ref1, atol=1e-5, rtol=1e-5), "mismatch (B=8)"

    # Ragged batch (exercises row padding / slicing).
    x2 = jax.random.normal(k_x2, (12, input_dim), jnp.float32)
    out2 = jax.block_until_ready(mlp_forward(x2, padded_params, num_classes))
    ref2 = mlp_reference(x2, raw_params)
    assert out2.shape == (12, num_classes)
    assert jnp.allclose(out2, ref2, atol=1e-5, rtol=1e-5), "mismatch (B=12)"

    print("KERNEL_OK")
</pallas_src>

<mosaic_0001>
module attributes {stable_mosaic.version = 11 : i64} {
  func.func @mlp_kernel(%arg0: i32, %arg1: memref<8x128xf32, #tpu.memory_space<vmem>>, %arg2: memref<128x256xf32, #tpu.memory_space<vmem>>, %arg3: memref<1x256xf32, #tpu.memory_space<vmem>>, %arg4: memref<256x128xf32, #tpu.memory_space<vmem>>, %arg5: memref<1x128xf32, #tpu.memory_space<vmem>>, %arg6: memref<128x128xf32, #tpu.memory_space<vmem>>, %arg7: memref<1x128xf32, #tpu.memory_space<vmem>>, %arg8: memref<8x128xf32, #tpu.memory_space<vmem>>) attributes {dimension_semantics = [#tpu.dimension_semantics<parallel>], iteration_bounds = array<i64: 1>, scalar_prefetch = 0 : i64, scratch_operands = 0 : i64, tpu.core_type = #tpu.core_type<tc>, window_params = [{transform_indices = @transform_0, window_bounds = array<i64: 8, 128>}, {pipeline_mode = #tpu.pipeline_mode<synchronous>, transform_indices = @transform_1, window_bounds = array<i64: 128, 256>}, {pipeline_mode = #tpu.pipeline_mode<synchronous>, transform_indices = @transform_2, window_bounds = array<i64: 1, 256>}, {pipeline_mode = #tpu.pipeline_mode<synchronous>, transform_indices = @transform_3, window_bounds = array<i64: 256, 128>}, {pipeline_mode = #tpu.pipeline_mode<synchronous>, transform_indices = @transform_4, window_bounds = array<i64: 1, 128>}, {pipeline_mode = #tpu.pipeline_mode<synchronous>, transform_indices = @transform_5, window_bounds = array<i64: 128, 128>}, {pipeline_mode = #tpu.pipeline_mode<synchronous>, transform_indices = @transform_6, window_bounds = array<i64: 1, 128>}, {transform_indices = @transform_7, window_bounds = array<i64: 8, 128>}]} {
    %c0 = arith.constant 0 : index
    %c0_0 = arith.constant 0 : index
    %0 = vector.load %arg1[%c0, %c0_0] : memref<8x128xf32, #tpu.memory_space<vmem>>, vector<8x128xf32>
    %c0_1 = arith.constant 0 : index
    %c0_2 = arith.constant 0 : index
    %1 = vector.load %arg2[%c0_1, %c0_2] : memref<128x256xf32, #tpu.memory_space<vmem>>, vector<128x256xf32>
    %cst = arith.constant dense<0.000000e+00> : vector<8x256xf32>
    %2 = tpu.matmul %0, %1, %cst {dimension_numbers = #tpu.dot_dimension_numbers<[1], [0], [0], [1], [0, 0, 1, 1], [], []>} : vector<8x128xf32>, vector<128x256xf32>, vector<8x256xf32> -> vector<8x256xf32>
    %c0_3 = arith.constant 0 : index
    %c0_4 = arith.constant 0 : index
    %3 = vector.load %arg3[%c0_3, %c0_4] : memref<1x256xf32, #tpu.memory_space<vmem>>, vector<1x256xf32>
    %4 = vector.broadcast %3 : vector<1x256xf32> to vector<8x256xf32>
    %5 = arith.addf %2, %4 : vector<8x256xf32>
    %cst_5 = arith.constant 0.000000e+00 : f32
    %6 = vector.broadcast %cst_5 : f32 to vector<8x256xf32>
    %7 = arith.maximumf %5, %6 : vector<8x256xf32>
    %c0_6 = arith.constant 0 : index
    %c0_7 = arith.constant 0 : index
    %8 = vector.load %arg4[%c0_6, %c0_7] : memref<256x128xf32, #tpu.memory_space<vmem>>, vector<256x128xf32>
    %cst_8 = arith.constant dense<0.000000e+00> : vector<8x128xf32>
    %9 = tpu.matmul %7, %8, %cst_8 {dimension_numbers = #tpu.dot_dimension_numbers<[1], [0], [0], [1], [0, 0, 1, 1], [], []>} : vector<8x256xf32>, vector<256x128xf32>, vector<8x128xf32> -> vector<8x128xf32>
    %c0_9 = arith.constant 0 : index
    %c0_10 = arith.constant 0 : index
    %10 = vector.load %arg5[%c0_9, %c0_10] : memref<1x128xf32, #tpu.memory_space<vmem>>, vector<1x128xf32>
    %11 = vector.broadcast %10 : vector<1x128xf32> to vector<8x128xf32>
    %12 = arith.addf %9, %11 : vector<8x128xf32>
    %cst_11 = arith.constant 0.000000e+00 : f32
    %13 = vector.broadcast %cst_11 : f32 to vector<8x128xf32>
    %14 = arith.maximumf %12, %13 : vector<8x128xf32>
    %c0_12 = arith.constant 0 : index
    %c0_13 = arith.constant 0 : index
    %15 = vector.load %arg6[%c0_12, %c0_13] : memref<128x128xf32, #tpu.memory_space<vmem>>, vector<128x128xf32>
    %cst_14 = arith.constant dense<0.000000e+00> : vector<8x128xf32>
    %16 = tpu.matmul %14, %15, %cst_14 {dimension_numbers = #tpu.dot_dimension_numbers<[1], [0], [0], [1], [0, 0, 1, 1], [], []>} : vector<8x128xf32>, vector<128x128xf32>, vector<8x128xf32> -> vector<8x128xf32>
    %c0_15 = arith.constant 0 : index
    %c0_16 = arith.constant 0 : index
    %17 = vector.load %arg7[%c0_15, %c0_16] : memref<1x128xf32, #tpu.memory_space<vmem>>, vector<1x128xf32>
    %18 = vector.broadcast %17 : vector<1x128xf32> to vector<8x128xf32>
    %19 = arith.addf %16, %18 : vector<8x128xf32>
    %c0_17 = arith.constant 0 : index
    %c0_18 = arith.constant 0 : index
    %20 = vector.load %arg8[%c0_17, %c0_18] : memref<8x128xf32, #tpu.memory_space<vmem>>, vector<8x128xf32>
    tpu.vector_store %arg8[%c0_17, %c0_18], %19 {strides = array<i32>} : memref<8x128xf32, #tpu.memory_space<vmem>>, vector<8x128xf32>,
    return
  }
  func.func @transform_0(%arg0: i32) -> (i32, i32) {
    %c0_i32 = arith.constant 0 : i32
    %c0_i32_0 = arith.constant 0 : i32
    return %arg0, %c0_i32 : i32, i32
  }
  func.func @transform_1(%arg0: i32) -> (i32, i32) {
    %c0_i32 = arith.constant 0 : i32
    %c0_i32_0 = arith.constant 0 : i32
    %c0_i32_1 = arith.constant 0 : i32
    return %c0_i32, %c0_i32_0 : i32, i32
  }
  func.func @transform_2(%arg0: i32) -> (i32, i32) {
    %c0_i32 = arith.constant 0 : i32
    %c0_i32_0 = arith.constant 0 : i32
    %c0_i32_1 = arith.constant 0 : i32
    return %c0_i32, %c0_i32_0 : i32, i32
  }
  func.func @transform_3(%arg0: i32) -> (i32, i32) {
    %c0_i32 = arith.constant 0 : i32
    %c0_i32_0 = arith.constant 0 : i32
    %c0_i32_1 = arith.constant 0 : i32
    return %c0_i32, %c0_i32_0 : i32, i32
  }
  func.func @transform_4(%arg0: i32) -> (i32, i32) {
    %c0_i32 = arith.constant 0 : i32
    %c0_i32_0 = arith.constant 0 : i32
    %c0_i32_1 = arith.constant 0 : i32
    return %c0_i32, %c0_i32_0 : i32, i32
  }
  func.func @transform_5(%arg0: i32) -> (i32, i32) {
    %c0_i32 = arith.constant 0 : i32
    %c0_i32_0 = arith.constant 0 : i32
    %c0_i32_1 = arith.constant 0 : i32
    return %c0_i32, %c0_i32_0 : i32, i32
  }
  func.func @transform_6(%arg0: i32) -> (i32, i32) {
    %c0_i32 = arith.constant 0 : i32
    %c0_i32_0 = arith.constant 0 : i32
    %c0_i32_1 = arith.constant 0 : i32
    return %c0_i32, %c0_i32_0 : i32, i32
  }
  func.func @transform_7(%arg0: i32) -> (i32, i32) {
    %c0_i32 = arith.constant 0 : i32
    %c0_i32_0 = arith.constant 0 : i32
    return %arg0, %c0_i32 : i32, i32
  }
}

</mosaic_0001>

<bundles_post_ra>
// kernel: tpu_custom_call.1
= control target key start
LH: loop header
LB: loop body
LE: loop exit
PB: predicated region body
PF: predicated region fallthrough
CT: control target
= control target key end

     0   :  { %12 = vsyncpa [#allocation3], 0  ;;  %s849_s0 = inlined_call_operand.hbm [shape: f32[8,128], index: 0, kind: input, shape index: {}]   ;;  %s850_s1 = inlined_call_operand.hbm [shape: f32[128,256], index: 1, kind: input, shape index: {}]   ;;  %s851_s2 = inlined_call_operand.vmem [shape: f32[1,256], index: 2, kind: input, shape index: {}]   ;;  %s852_s3 = inlined_call_operand.hbm [shape: f32[256,128], index: 3, kind: input, shape index: {}]   ;;  %s853_s4 = inlined_call_operand.vmem [shape: f32[1,128], index: 4, kind: input, shape index: {}]   ;;  %s854_s5 = inlined_call_operand.hbm [shape: f32[128,128], index: 5, kind: input, shape index: {}]   ;;  %s855_s6 = inlined_call_operand.vmem [shape: f32[1,128], index: 6, kind: input, shape index: {}]   ;;  %s856_s7 = inlined_call_operand.hbm [shape: f32[8,128], index: 7, kind: output, shape index: {}]  }
   0x1   :  { %13 = vsyncpa [#allocation6], 0 }
   0x2   :  { %14 = vsyncpa [#allocation9], 0 }
   0x3   :  { %15 = vsyncpa [#allocation4], 0  ;;  %s726_s24 = smov [#allocation5]   ;;  %s608_s28 = scalar_lea.hbm %s850_s1, 4096 }
   0x4   :  { %s31_s25 = sshll.u32 %s726_s24, 4  ;;  %p609_p0 = scmp.ne.s32.totalorder %s850_s1, %s608_s28  ;;  %s32_s25 = int_to_ptr.vmem [resolvable:$true] %s31_s25 }
   0x5   :  { %p612_p1 = scmp.lt.u32.totalorder %s608_s28, %s850_s1 }
   0x7   :  { %p614_p2 = pnand %p612_p1, %p609_p0 }
   0x9   :  { %617 = shalt.err (!%p614_p2)
}
   0xa   :  { %s618_s10 = scalar_lea.vmem %s32_s25, 4096  ;;  %p623_p4 = scmp.lt.s32.totalorder %s32_s25, %s32_s25 }
   0xb   :  { %p619_p3 = scmp.ne.s32.totalorder %s32_s25, %s618_s10  ;;  %p624_p5 = scmp.lt.s32.totalorder %s618_s10, %s618_s10 }
   0xd   :  { %p625_p6 = por %p624_p5, %p623_p4 }
   0xf   :  { %p626_p7 = pnand %p625_p6, %p619_p3 }
  0x11   :  { %629 = shalt.err (!%p626_p7)
}
  0x12   :  { %s727_s11 = smov 256   ;;  %s728_s12 = smov 16  }
  0x13   :  { %37 = dma.hbm_to_vmem [thread:$0]  %s850_s1, 4096, %s32_s25, [#allocation6], %s727_s11, %s727_s11, %s728_s12  }
  0x14   :  { %s729_s15 = smov [#allocation2]   ;;  %s730_s17 = smov [#allocation7]  }
  0x15   :  { %s22_s16 = sshll.u32 %s729_s15, 4  ;;  %s45_s18 = sshll.u32 %s730_s17, 4  ;;  %s23_s16 = int_to_ptr.vmem [resolvable:$true] %s22_s16  ;;  %s46_s18 = int_to_ptr.vmem [resolvable:$true] %s45_s18 }
  0x16   :  { %s630_s21 = scalar_lea.hbm %s849_s0, 128 }
  0x17   :  { %p631_p8 = scmp.ne.s32.totalorder %s849_s0, %s630_s21  ;;  %p634_p9 = scmp.lt.u32.totalorder %s630_s21, %s849_s0 }
  0x19   :  { %p636_p10 = pnand %p634_p9, %p631_p8 }
  0x1b   :  { %639 = shalt.err (!%p636_p10)
}
  0x1c   :  { %s640_s1 = scalar_lea.vmem %s23_s16, 128  ;;  %p645_p12 = scmp.lt.s32.totalorder %s23_s16, %s23_s16 }
  0x1d   :  { %p641_p11 = scmp.ne.s32.totalorder %s23_s16, %s640_s1  ;;  %p646_p13 = scmp.lt.s32.totalorder %s640_s1, %s640_s1 }
  0x1f   :  { %p647_p0 = por %p646_p13, %p645_p12 }
  0x21   :  { %p648_p1 = pnand %p647_p0, %p641_p11 }
  0x23   :  { %651 = shalt.err (!%p648_p1)
}
  0x24   :  { %25 = dma.hbm_to_vmem [thread:$0]  %s849_s0, 128, %s23_s16, [#allocation3]  }
  0x25   :  { %s652_s30 = scalar_lea.hbm %s852_s3, 4096 }
  0x26   :  { %p653_p2 = scmp.ne.s32.totalorder %s852_s3, %s652_s30  ;;  %p656_p3 = scmp.lt.u32.totalorder %s652_s30, %s852_s3 }
  0x28   :  { %p658_p4 = pnand %p656_p3, %p653_p2 }
  0x2a   :  { %661 = shalt.err (!%p658_p4)
}
  0x2b   :  { %s662_s12 = scalar_lea.vmem %s46_s18, 4096  ;;  %p667_p6 = scmp.lt.s32.totalorder %s46_s18, %s46_s18 }
  0x2c   :  { %p663_p5 = scmp.ne.s32.totalorder %s46_s18, %s662_s12  ;;  %p668_p7 = scmp.lt.s32.totalorder %s662_s12, %s662_s12 }
  0x2e   :  { %p669_p8 = por %p668_p7, %p667_p6 }
  0x30   :  { %p670_p9 = pnand %p669_p8, %p663_p5 }
  0x32   :  { %673 = shalt.err (!%p670_p9)
}
  0x33   :  { %s731_s0 = smov 128   ;;  %s732_s13 = smov 8  }
  0x34   :  { %51 = dma.hbm_to_vmem [thread:$0]  %s852_s3, 4096, %s46_s18, [#allocation6], %s731_s0, %s731_s0, %s732_s13  }
  0x35   :  { %s733_s16 = smov [#allocation8]   ;;  %s674_s21 = scalar_lea.hbm %s854_s5, 2048 }
  0x36   :  { %s59_s17 = sshll.u32 %s733_s16, 4  ;;  %p675_p10 = scmp.ne.s32.totalorder %s854_s5, %s674_s21  ;;  %s60_s17 = int_to_ptr.vmem [resolvable:$true] %s59_s17 }
  0x37   :  { %p678_p11 = scmp.lt.u32.totalorder %s674_s21, %s854_s5 }
  0x39   :  { %p680_p12 = pnand %p678_p11, %p675_p10 }
  0x3b   :  { %683 = shalt.err (!%p680_p12)
}
  0x3c   :  { %s684_s1 = scalar_lea.vmem %s60_s17, 2048  ;;  %p689_p0 = scmp.lt.s32.totalorder %s60_s17, %s60_s17 }
  0x3d   :  { %p685_p13 = scmp.ne.s32.totalorder %s60_s17, %s684_s1  ;;  %p690_p1 = scmp.lt.s32.totalorder %s684_s1, %s684_s1 }
  0x3f   :  { %p691_p2 = por %p690_p1, %p689_p0 }
  0x41   :  { %p692_p3 = pnand %p691_p2, %p685_p13 }
  0x43   :  { %695 = shalt.err (!%p692_p3)
}
  0x44   :  { %65 = dma.hbm_to_vmem [thread:$0]  %s854_s5, 2048, %s60_s17, [#allocation9], %s731_s0, %s731_s0, %s732_s13  }
  0x45   :  { %718 = dma.done.wait [#allocation3], 128  }
  0x46   :  { %719 = vsyncadd [#allocation3], 4294967168 }
  0x47   :  { %720 = dma.done.wait [#allocation6], 8192  }
  0x48   :  { %721 = vsyncadd [#allocation6], 4294959104 }
  0x49   :  { %722 = dma.done.wait [#allocation9], 2048  }
  0x4a   :  { %723 = vsyncadd [#allocation9], 4294965248  ;;  %v734_v0 = vmov 0.0   ;;  %v82_v1 = vld [vmem:[#allocation5 + $0x8] sm:$0xff]  ;;  %v84_v2 = vld [vmem:[#allocation5 + $0x18] sm:$0xff]  ;;  %vm736_vm0 = vmmov 0  }
  0x4b   :  { %189 = vmatprep.mubr.f32.mxu0 %v734_v0  ;;  %v81_v3 = vld [vmem:[#allocation5] sm:$0xff]  ;;  %v508_v4 = vpack.c.bf16 %v84_v2, %v82_v1  ;;  %v83_v5 = vld [vmem:[#allocation5 + $0x10] sm:$0xff]  ;;  %v86_v6 = vld [vmem:[#allocation5 + $0x28] sm:$0xff]  ;;  %s737_s30 = smov [#allocation10]  }
  0x4c   :  { %v88_v7 = vld [vmem:[#allocation5 + $0x38] sm:$0xff]  ;;  %v510_v8 = vpack.c.bf16 %v83_v5, %v81_v3  ;;  %v85_v10 = vld [vmem:[#allocation5 + $0x20] sm:$0xff]  ;;  %v87_v11 = vld [vmem:[#allocation5 + $0x30] sm:$0xff]  ;;  %s408_s8 = sshll.u32 %s737_s30, 4  ;;  %s409_s8 = int_to_ptr.vmem [resolvable:$true] %s408_s8 }
  0x4d   :  { %v512_v9 = vpack.c.bf16 %v88_v7, %v86_v6  ;;  %v90_v12 = vld [vmem:[#allocation5 + $0x48] sm:$0xff]  ;;  %509 = vmatprep.subr.bf16.mxu0 %v508_v4  ;;  %v92_v13 = vld [vmem:[#allocation5 + $0x58] sm:$0xff]  ;;  %v514_v14 = vpack.c.bf16 %v87_v11, %v85_v10  ;;  %v89_v16 = vld [vmem:[#allocation5 + $0x40] sm:$0xff]  ;;  %s696_s9 = scalar_lea.vmem %s409_s8, 128  ;;  %p701_p5 = scmp.lt.s32.totalorder %s409_s8, %s409_s8 }
  0x4e   :  { %511 = vmatpush1.bf16.msra.mxu0 %v510_v8  ;;  %v516_v15 = vpack.c.bf16 %v92_v13, %v90_v12  ;;  %v91_v17 = vld [vmem:[#allocation5 + $0x50] sm:$0xff]  ;;  %v94_v18 = vld [vmem:[#allocation5 + $0x68] sm:$0xff]  ;;  %v96_v19 = vld [vmem:[#allocation5 + $0x78] sm:$0xff]  ;;  %p697_p4 = scmp.ne.s32.totalorder %s409_s8, %s696_s9  ;;  %p702_p6 = scmp.lt.s32.totalorder %s696_s9, %s696_s9 }
  0x4f   :  { %513 = vmatprep.subr.bf16.mxu0 %v512_v9  ;;  %v518_v20 = vpack.c.bf16 %v91_v17, %v89_v16  ;;  %v520_v21 = vpack.c.bf16 %v96_v19, %v94_v18  ;;  %v93_v22 = vld [vmem:[#allocation5 + $0x60] sm:$0xff]  ;;  %v95_v23 = vld [vmem:[#allocation5 + $0x70] sm:$0xff]  ;;  %v98_v24 = vld [vmem:[#allocation5 + $0x88] sm:$0xff] }
  0x50   :  { %v100_v25 = vld [vmem:[#allocation5 + $0x98] sm:$0xff]  ;;  %v97_v26 = vld [vmem:[#allocation5 + $0x80] sm:$0xff]  ;;  %v99_v27 = vld [vmem:[#allocation5 + $0x90] sm:$0xff]  ;;  %v522_v31 = vpack.c.bf16 %v95_v23, %v93_v22  ;;  %p703_p7 = por %p702_p6, %p701_p5 }
  0x51   :  { %v214_v28 = vld [vmem:[#allocation7 + $0x80] sm:$0xff]  ;;  %v215_v29 = vld [vmem:[#allocation7 + $0x88] sm:$0xff]  ;;  %v216_v34 = vld [vmem:[#allocation7 + $0x90] sm:$0xff]  ;;  %v524_v36 = vpack.c.bf16 %v100_v25, %v98_v24  ;;  %v526_v46 = vpack.c.bf16 %v99_v27, %v97_v26 }
  0x52   :  { %515 = vmatpush1.bf16.msra.mxu0 %v514_v14  ;;  %v198_v30 = vld [vmem:[#allocation7] sm:$0xff]  ;;  %v540_v32 = vpack.c.bf16 %v215_v29, %v214_v28  ;;  %v199_v33 = vld [vmem:[#allocation7 + $0x8] sm:$0xff]  ;;  %v217_v35 = vld [vmem:[#allocation7 + $0x98] sm:$0xff]  ;;  %p704_p8 = pnand %p703_p7, %p697_p4 }
  0x53   :  { %517 = vmatprep.subr.bf16.mxu0 %v516_v15  ;;  %v542_v37 = vpack.c.bf16 %v199_v33, %v198_v30  ;;  %v544_v38 = vpack.c.bf16 %v217_v35, %v216_v34  ;;  %v200_v39 = vld [vmem:[#allocation7 + $0x10] sm:$0xff]  ;;  %v201_v40 = vld [vmem:[#allocation7 + $0x18] sm:$0xff]  ;;  %v218_v41 = vld [vmem:[#allocation7 + $0xa0] sm:$0xff] }
  0x54   :  { %v102_v42 = vld [vmem:[#allocation5 + $0xa8] sm:$0xff]  ;;  %v104_v43 = vld [vmem:[#allocation5 + $0xb8] sm:$0xff]  ;;  %541 = vmatprep.subr.bf16.mxu1 %v540_v32  ;;  %v546_v45 = vpack.c.bf16 %v201_v40, %v200_v39  ;;  %v101_v47 = vld [vmem:[#allocation5 + $0xa0] sm:$0xff] }
  0x55   :  { %v219_v44 = vld [vmem:[#allocation7 + $0xa8] sm:$0xff]  ;;  %543 = vmatpush3.bf16.msra.mxu1 %v542_v37  ;;  %v202_v49 = vld [vmem:[#allocation7 + $0x20] sm:$0xff]  ;;  %v528_v51 = vpack.c.bf16 %v104_v43, %v102_v42  ;;  %v103_v52 = vld [vmem:[#allocation5 + $0xb0] sm:$0xff] }
  0x56   :  { %519 = vmatpush1.bf16.msra.mxu0 %v518_v20  ;;  %545 = vmatprep.subr.bf16.mxu1 %v544_v38  ;;  %v548_v48 = vpack.c.bf16 %v219_v44, %v218_v41  ;;  %v203_v50 = vld [vmem:[#allocation7 + $0x28] sm:$0xff]  ;;  %v220_v53 = vld [vmem:[#allocation7 + $0xb0] sm:$0xff]  ;;  %v221_v54 = vld [vmem:[#allocation7 + $0xb8] sm:$0xff]  ;;  %v530_v58 = vpack.c.bf16 %v103_v52, %v101_v47  ;;  %v735_v38 = vmov 0.0|0.0  }
  0x57   :  { %521 = vmatprep.subr.bf16.mxu0 %v520_v21  ;;  %v106_v55 = vld [vmem:[#allocation5 + $0xc8] sm:$0xff]  ;;  %v108_v56 = vld [vmem:[#allocation5 + $0xd8] sm:$0xff]  ;;  %v550_v57 = vpack.c.bf16 %v203_v50, %v202_v49  ;;  %v105_v59 = vld [vmem:[#allocation5 + $0xc0] sm:$0xff]  ;;  %v552_v60 = vpack.c.bf16 %v221_v54, %v220_v53  ;;  %v115_v54 = vlaneseq }
  0x58   :  { %v204_v61 = vld [vmem:[#allocation7 + $0x30] sm:$0xff]  ;;  %v205_v62 = vld [vmem:[#allocation7 + $0x38] sm:$0xff]  ;;  %v532_v63 = vpack.c.bf16 %v108_v56, %v106_v55  ;;  %v222_v2 = vld [vmem:[#allocation7 + $0xc0] sm:$0xff] }
  0x59   :  { %547 = vmatpush3.bf16.msra.mxu1 %v546_v45  ;;  %v107_v1 = vld [vmem:[#allocation5 + $0xd0] sm:$0xff]  ;;  %v223_v3 = vld [vmem:[#allocation7 + $0xc8] sm:$0xff]  ;;  %v112_v5 = vld [vmem:[#allocation5 + $0xf8] sm:$0xff]  ;;  %v554_v6 = vpack.c.bf16 %v205_v62, %v204_v61  ;;  %v116_v55 = vshrl.u32 %v115_v54, 7 }
  0x5a   :  { %523 = vmatpush1.bf16.msra.mxu0 %v522_v31  ;;  %549 = vmatprep.subr.bf16.mxu1 %v548_v48  ;;  %v110_v4 = vld [vmem:[#allocation5 + $0xe8] sm:$0xff]  ;;  %v534_v7 = vpack.c.bf16 %v107_v1, %v105_v59  ;;  %v109_v8 = vld [vmem:[#allocation5 + $0xe0] sm:$0xff]  ;;  %v556_v9 = vpack.c.bf16 %v223_v3, %v222_v2  ;;  %v111_v13 = vld [vmem:[#allocation5 + $0xf0] sm:$0xff] }
  0x5b   :  { %525 = vmatprep.subr.bf16.mxu0 %v524_v36  ;;  %v206_v10 = vld [vmem:[#allocation7 + $0x40] sm:$0xff]  ;;  %v207_v11 = vld [vmem:[#allocation7 + $0x48] sm:$0xff]  ;;  %v536_v12 = vpack.c.bf16 %v112_v5, %v110_v4  ;;  %v224_v14 = vld [vmem:[#allocation7 + $0xd0] sm:$0xff]  ;;  %v538_v17 = vpack.c.bf16 %v111_v13, %v109_v8  ;;  %v117_v56 = vsub.s32 0, %v116_v55 }
  0x5c   :  { %v225_v15 = vld [vmem:[#allocation7 + $0xd8] sm:$0xff]  ;;  %v558_v16 = vpack.c.bf16 %v207_v11, %v206_v10  ;;  %v208_v19 = vld [vmem:[#allocation7 + $0x50] sm:$0xff]  ;;  %v226_v21 = vld [vmem:[#allocation7 + $0xe0] sm:$0xff] }
  0x5d   :  { %551 = vmatpush3.bf16.msra.mxu1 %v550_v57  ;;  %v560_v18 = vpack.c.bf16 %v225_v15, %v224_v14  ;;  %v209_v20 = vld [vmem:[#allocation7 + $0x58] sm:$0xff]  ;;  %v227_v22 = vld [vmem:[#allocation7 + $0xe8] sm:$0xff]  ;;  %v210_v26 = vld [vmem:[#allocation7 + $0x60] sm:$0xff] }
  0x5e   :  { %527 = vmatpush1.bf16.msra.mxu0 %v526_v46  ;;  %553 = vmatprep.subr.bf16.mxu1 %v552_v60  ;;  %v562_v23 = vpack.c.bf16 %v209_v20, %v208_v19  ;;  %v80_v24 = vld [vmem:[#allocation2] sm:$0xff]  ;;  %v564_v25 = vpack.c.bf16 %v227_v22, %v226_v21  ;;  %v211_v27 = vld [vmem:[#allocation7 + $0x68] sm:$0xff]  ;;  %v228_v29 = vld [vmem:[#allocation7 + $0xf0] sm:$0xff] }
  0x5f   :  { %529 = vmatprep.subr.bf16.mxu0 %v528_v51  ;;  %v566_v28 = vpack.c.bf16 %v211_v27, %v210_v26  ;;  %v229_v30 = vld [vmem:[#allocation7 + $0xf8] sm:$0xff]  ;;  %v212_v32 = vld [vmem:[#allocation7 + $0x70] sm:$0xff]  ;;  %v308_v35 = vld [vmem:[#allocation8] sm:$0xff] }
  0x60   :  { %v568_v31 = vpack.c.bf16 %v229_v30, %v228_v29  ;;  %v213_v33 = vld [vmem:[#allocation7 + $0x78] sm:$0xff]  ;;  %v309_v36 = vld [vmem:[#allocation8 + $0x8] sm:$0xff]  ;;  %v310_v37 = vld [vmem:[#allocation8 + $0x10] sm:$0xff] }
  0x61   :  { %555 = vmatpush3.bf16.msra.mxu1 %v554_v6  ;;  %v570_v34 = vpack.c.bf16 %v213_v33, %v212_v32  ;;  %v573_v39 = vpack.c.bf16 %v309_v36, %v308_v35  ;;  %v311_v40 = vld [vmem:[#allocation8 + $0x18] sm:$0xff]  ;;  %v312_v42 = vld [vmem:[#allocation8 + $0x20] sm:$0xff]  ;;  %v313_v43 = vld [vmem:[#allocation8 + $0x28] sm:$0xff] }
  0x62   :  { %531 = vmatpush1.bf16.msra.mxu0 %v530_v58  ;;  %557 = vmatprep.subr.bf16.mxu1 %v556_v9  ;;  %v576_v41 = vpack.c.bf16 %v311_v40, %v310_v37  ;;  %v579_v44 = vpack.c.bf16 %v313_v43, %v312_v42  ;;  %v314_v45 = vld [vmem:[#allocation8 + $0x30] sm:$0xff]  ;;  %v315_v46 = vld [vmem:[#allocation8 + $0x38] sm:$0xff]  ;;  %v316_v48 = vld [vmem:[#allocation8 + $0x40] sm:$0xff]  ;;  %v121_v58 = vsub.s32 1, %v116_v55 }
  0x63   :  { %533 = vmatprep.subr.bf16.mxu0 %v532_v63  ;;  %v582_v47 = vpack.c.bf16 %v315_v46, %v314_v45  ;;  %v317_v49 = vld [vmem:[#allocation8 + $0x48] sm:$0xff]  ;;  %v318_v51 = vld [vmem:[#allocation8 + $0x50] sm:$0xff]  ;;  %v319_v52 = vld [vmem:[#allocation8 + $0x58] sm:$0xff] }
  0x64   :  { %v585_v50 = vpack.c.bf16 %v317_v49, %v316_v48  ;;  %v588_v53 = vpack.c.bf16 %v319_v52, %v318_v51  ;;  %v113_v57 = vld [vmem:[%s851_s2] sm:$0x3]  ;;  %v320_v4 = vld [vmem:[#allocation8 + $0x60] sm:$0xff]  ;;  %v321_v5 = vld [vmem:[#allocation8 + $0x68] sm:$0xff] }
  0x65   :  { %559 = vmatpush3.bf16.msra.mxu1 %v558_v16  ;;  %v118_v59 = vrot.slane %v113_v57, %v117_v56  ;;  %v122_v60 = vrot.slane %v113_v57, %v121_v58  ;;  %v591_v6 = vpack.c.bf16 %v321_v5, %v320_v4  ;;  %v323_v8 = vld [vmem:[#allocation8 + $0x78] sm:$0xff] }
  0x66   :  { %535 = vmatpush1.bf16.msra.mxu0 %v534_v7  ;;  %561 = vmatprep.subr.bf16.mxu1 %v560_v18  ;;  %v322_v7 = vld [vmem:[#allocation8 + $0x70] sm:$0xff]  ;;  %v419_v11 = vld [vmem:[%s853_s4] ss:$0 sm:$0xff] }
  0x67   :  { %537 = vmatprep.subr.bf16.mxu0 %v536_v12  ;;  %v594_v9 = vpack.c.bf16 %v323_v8, %v322_v7  ;;  %v420_v16 = vld [vmem:[%s855_s6] ss:$0 sm:$0xff] }
  0x69   :  { %563 = vmatpush3.bf16.msra.mxu1 %v562_v23 }
  0x6a   :  { %539 = vmatpush1.bf16.msra.mxu0 %v538_v17  ;;  %565 = vmatprep.subr.bf16.mxu1 %v564_v25 }
  0x6b   :  { %572 = vmatprep.subr.bf16.mxu0 %v735_v38 }
  0x6d   :  { %190 = vmatmul.mubr.f32.vlgmr.msra.gmra.mrb[0].mxu0 %v80_v24  ;;  %567 = vmatpush3.bf16.msra.mxu1 %v566_v28 }
  0x6e   :  { %569 = vmatprep.subr.bf16.mxu1 %v568_v31  ;;  %574 = vmatpush3.bf16.msra.mxu0 %v573_v39 }
  0x6f   :  { %575 = vmatprep.subr.bf16.mxu0 %v735_v38  ;;  %505 = vmatprep.mubr.msk.f32.mxu0 %vm736_vm0, %v734_v0 }
  0x71   :  { %571 = vmatpush3.bf16.msra.mxu1 %v570_v34 }
  0x72   :  { %577 = vmatpush3.bf16.msra.mxu0 %v576_v41 }
  0x73   :  { %578 = vmatprep.subr.bf16.mxu0 %v735_v38 }
  0x76   :  { %580 = vmatpush3.bf16.msra.mxu0 %v579_v44 }
  0x77   :  { %581 = vmatprep.subr.bf16.mxu0 %v735_v38 }
  0x7a   :  { %583 = vmatpush3.bf16.msra.mxu0 %v582_v47 }
  0x7b   :  { %584 = vmatprep.subr.bf16.mxu0 %v735_v38 }
  0x7e   :  { %586 = vmatpush3.bf16.msra.mxu0 %v585_v50 }
  0x7f   :  { %587 = vmatprep.subr.bf16.mxu0 %v735_v38 }
  0x82   :  { %589 = vmatpush3.bf16.msra.mxu0 %v588_v53 }
  0x83   :  { %590 = vmatprep.subr.bf16.mxu0 %v735_v38 }
  0x86   :  { %592 = vmatpush3.bf16.msra.mxu0 %v591_v6 }
  0x87   :  { %593 = vmatprep.subr.bf16.mxu0 %v735_v38 }
  0x8a   :  { %595 = vmatpush3.bf16.msra.mxu0 %v594_v9 }
 0x140   :  { %v191_v61 = vpop.f32.mrb[0].mxu0 }
 0x141   :  { %v192_v62 = vadd.f32 %v191_v61, %v118_v59  ;;  %v193_v63 = vpop.f32.mrb[1].mxu0 }
 0x142   :  { %v194_v1 = vadd.f32 %v193_v63, %v122_v60 }
 0x143   :  { %v196_v3 = vmax.f32 %v192_v62, 0.0 }
 0x144   :  { %v197_v2 = vmax.f32 %v194_v1, 0.0 }
 0x146   :  { %301 = vmatprep.mubr.f32.mxu1 %v197_v2 }
 0x147   :  { %302 = vmatmul.mubr.f32.vlgmr.msra.gmra.mrb[0].mxu1 %v196_v3 }
 0x21a   :  { %v453_v10 = vpop.f32.mrb[0].mxu1 }
 0x21b   :  { %v454_v12 = vpop.f32.mrb[1].mxu1 }
 0x21c   :  { %v455_v13 = vadd.f32 %v454_v12, %v453_v10 }
 0x21e   :  { %v304_v14 = vadd.f32 %v455_v13, %v419_v11 }
 0x220   :  { %v307_v15 = vmax.f32 %v304_v14, 0.0 }
 0x222   :  { %506 = vmatmul.mubr.f32.vlgmr.msra.gmra.mrb[2].mxu0 %v307_v15 }
 0x2f5   :  { %v397_v17 = vpop.f32.mrb[2].mxu0 }
 0x2f6   :  { %v398_v18 = vadd.f32 %v420_v16, %v397_v17  ;;  %v507_v19 = vpop.f32.mrb[3].mxu0 }
 0x2f8   :  { %401 = vst [vmem:[#allocation10] sm:$0xff] %v398_v18 }
 0x2f9   :  { %707 = shalt.err (!%p704_p8)
}
 0x2fa   :  { %s708_s11 = scalar_lea.hbm %s856_s7, 128 }
 0x2fb   :  { %p709_p9 = scmp.ne.s32.totalorder %s856_s7, %s708_s11  ;;  %p712_p10 = scmp.lt.u32.totalorder %s708_s11, %s856_s7 }
 0x2fd   :  { %p714_p11 = pnand %p712_p10, %p709_p9 }
 0x2ff   :  { %717 = shalt.err (!%p714_p11)
}
 0x300   :  { %411 = dma.vmem_to_hbm [thread:$0]  %s409_s8, 128, %s856_s7, [#allocation4]  }
 0x301   :  { %724 = dma.done.wait [#allocation4], 128  }
 0x302   :  { %725 = vsyncadd [#allocation4], 4294967168 }
 0x303   :  { %415 = vsyncpa [#allocation3], 1 }
 0x304   :  { %416 = vsyncpa [#allocation6], 1 }
 0x305   :  { %417 = vsyncpa [#allocation9], 1 }
 0x306   :  { %418 = vsyncpa [#allocation4], 1 }

</bundles_post_ra>
